<compile_context>
chip_gen: v5e
topology: v5e:2x2
jax: 0.10.0
libtpu: 0.0.40
codegen_flags: <defaults>
</compile_context>

<pallas_src>
import functools

import jax
import jax.numpy as jnp
from jax.experimental import pallas as pl
from jax.experimental.pallas import tpu as pltpu


_LANE = 128                     # lane width / min padded M / small row tile
_MAX_TM = 256                   # preferred Gram row tile (matches 256x256 MXU)
_MAX_TK = 2048                  # upper bound on the K tile
_FEAT_VMEM_BUDGET = 24 << 20    # budget for double-buffered (Mp, tk) f32 block


def _round_up(x, m):
    return (x + m - 1) // m * m


def _pad_features(x):
    """NCHW -> (M, K) f32 features, zero-padded to TPU-friendly (Mp, Kp)."""
    a, b, c, d = x.shape
    m, k = a * b, c * d
    mp = _round_up(max(m, _LANE), _LANE)

    # K tile: as large as possible (amortizes ~0.35us/step overhead; keeps the
    # DMA pipeline full on v5e) but small enough that the double-buffered
    # (Mp, tk) f32 block stays inside the budget (v7x: 64 MiB VMEM / TC).
    tk_budget = max(_LANE, (_FEAT_VMEM_BUDGET // (2 * mp * 4)) // _LANE * _LANE)
    tk_cap = max(_LANE, min(_MAX_TK, tk_budget))
    kp128 = _round_up(k, _LANE)
    n_k = max(1, -(-kp128 // tk_cap))                  # number of K tiles
    tk = _round_up(-(-kp128 // n_k), _LANE)            # minimize K padding
    kp = n_k * tk

    # Row tile: prefer >= 2 tiles along the leading "parallel" axis so v7x's
    # two TensorCores both get work; neutral on v5e/v6e (single TC).
    tm = _MAX_TM if (mp % _MAX_TM == 0 and mp // _MAX_TM >= 2) else _LANE

    feats = x.reshape(m, k).astype(jnp.float32)
    fp = jnp.pad(feats, ((0, mp - m), (0, kp - k)))
    return fp, m, k, mp, kp, tm, tk


def _vmem_limit_bytes(mp, tm, tk):
    feat = 2 * mp * tk * 4       # double-buffered (Mp, tk) feature block
    rows = 2 * tm * mp * 4       # double-buffered (tm, Mp) target / Gram block
    acc = tm * mp * 4            # f32 accumulator scratch
    total = feat + rows + acc + (6 << 20)   # compiler-internal headroom
    return int(min(max(total, 32 << 20), 48 << 20))


# ---------------- Pallas kernels ----------------

def _gram_kernel(feat_ref, gram_ref, acc_ref, *, tm, scale):
    # feat_ref: (Mp, tk)  all feature rows for the current K tile
    # gram_ref: (tm, Mp)  output Gram row block (f32)
    # acc_ref:  (tm, Mp)  f32 VMEM accumulator (persists across the K axis)
    i = pl.program_id(0)
    k = pl.program_id(1)

    @pl.when(k == 0)
    def _():
        acc_ref[...] = jnp.zeros_like(acc_ref)

    b = feat_ref[...]
    # Row tile is a slice of the block already in VMEM (no second HBM stream).
    a = feat_ref[pl.ds(pl.multiple_of(i * tm, tm), tm), :]
    # Contract last dim of BOTH operands: a @ b.T without an XLU transpose.
    acc_ref[...] += jax.lax.dot_general(
        a, b,
        dimension_numbers=(((1,), (1,)), ((), ())),
        preferred_element_type=jnp.float32,
    )

    @pl.when(k == pl.num_programs(1) - 1)
    def _():
        gram_ref[...] = acc_ref[...] * scale


def _style_loss_kernel(feat_ref, target_ref, partial_ref, acc_ref,
                       *, tm, scale, mse_scale):
    # Loss-only forward: the Gram row block is accumulated in VMEM and the MSE
    # against target_ref is fused at k == last; only one scalar partial sum
    # per row tile leaves the kernel (no (Mp, Mp) HBM writeback).
    i = pl.program_id(0)
    k = pl.program_id(1)

    @pl.when(k == 0)
    def _():
        acc_ref[...] = jnp.zeros_like(acc_ref)

    b = feat_ref[...]
    a = feat_ref[pl.ds(pl.multiple_of(i * tm, tm), tm), :]
    acc_ref[...] += jax.lax.dot_general(
        a, b,
        dimension_numbers=(((1,), (1,)), ((), ())),
        preferred_element_type=jnp.float32,
    )

    @pl.when(k == pl.num_programs(1) - 1)
    def _():
        diff = acc_ref[...] * scale - target_ref[...]
        partial_ref[0, 0] = jnp.sum(diff * diff) * mse_scale


# ---------------- wrappers ----------------

def _gram_padded(fp, m, k, mp, kp, tm, tk):
    """(Mp, Mp) padded Gram matrix of padded features fp, scaled by 1/(M*K)."""
    scale = 1.0 / float(m * k)
    grid = (mp // tm, kp // tk)
    kern = functools.partial(_gram_kernel, tm=tm, scale=scale)
    return pl.pallas_call(
        kern,
        out_shape=jax.ShapeDtypeStruct((mp, mp), jnp.float32),
        grid_spec=pltpu.PrefetchScalarGridSpec(
            num_scalar_prefetch=0,
            grid=grid,
            in_specs=[
                pl.BlockSpec((mp, tk), lambda i, kk: (0, kk)),   # all rows
            ],
            out_specs=pl.BlockSpec((tm, mp), lambda i, kk: (i, 0)),
            scratch_shapes=[pltpu.VMEM((tm, mp), jnp.float32)],
        ),
        compiler_params=pltpu.CompilerParams(
            dimension_semantics=("parallel", "arbitrary"),
            vmem_limit_bytes=_vmem_limit_bytes(mp, tm, tk),
        ),
        cost_estimate=pl.CostEstimate(
            flops=2 * mp * mp * kp,
            transcendentals=0,
            # (Mp, Kp) features are restreamed once per row tile; Gram out.
            bytes_accessed=(mp // tm) * mp * kp * 4 + mp * mp * 4,
        ),
    )(fp)


def gram_matrix(x):
    """Gram matrix of NCHW tensor x, identical to the PyTorch reference."""
    fp, m, k, mp, kp, tm, tk = _pad_features(x)
    return _gram_padded(fp, m, k, mp, kp, tm, tk)[:m, :m]


class StyleLoss:
    """JAX/Pallas equivalent of the PyTorch StyleLoss module."""

    def __init__(self, target_feature):
        fp, m, k, mp, kp, tm, tk = _pad_features(target_feature)
        # Target Gram computed once (detached constant). Keep the padded copy
        # for the fused forward kernel; expose the valid corner as .target.
        self._target_p = _gram_padded(fp, m, k, mp, kp, tm, tk)
        self.target = self._target_p[:m, :m]
        self._m = m
        self.loss = None

    def forward(self, x):
        fp, m, k, mp, kp, tm, tk = _pad_features(x)
        if m != self._m:
            raise ValueError(
                f"feature/channel mismatch: input has N*C={m}, "
                f"target was built with N*C={self._m}")
        scale = 1.0 / float(m * k)
        mse_scale = 1.0 / float(m * m)   # padded entries are zero in G and T
        grid = (mp // tm, kp // tk)
        kern = functools.partial(_style_loss_kernel,
                                 tm=tm, scale=scale, mse_scale=mse_scale)
        partial = pl.pallas_call(
            kern,
            out_shape=jax.ShapeDtypeStruct((grid[0], 1), jnp.float32),
            grid_spec=pltpu.PrefetchScalarGridSpec(
                num_scalar_prefetch=0,
                grid=grid,
                in_specs=[
                    pl.BlockSpec((mp, tk), lambda i, kk: (0, kk)),   # all rows
                    pl.BlockSpec((tm, mp), lambda i, kk: (i, 0)),    # target
                ],
                out_specs=pl.BlockSpec((1, 1), lambda i, kk: (i, 0),
                                       memory_space=pltpu.SMEM),
                scratch_shapes=[pltpu.VMEM((tm, mp), jnp.float32)],
            ),
            compiler_params=pltpu.CompilerParams(
                dimension_semantics=("parallel", "arbitrary"),
                vmem_limit_bytes=_vmem_limit_bytes(mp, tm, tk),
            ),
            cost_estimate=pl.CostEstimate(
                flops=2 * mp * mp * kp,
                transcendentals=0,
                bytes_accessed=((mp // tm) * mp * kp * 4   # restreamed feats
                                + mp * mp * 4              # target Gram read
                                + (mp // tm) * 4),         # SMEM partials
            ),
        )(fp, self._target_p)
        # NOTE: .loss stored as a Python attribute mirrors the nn.Module
        # pattern; under jax.jit it becomes a tracer (known limitation).
        self.loss = jnp.sum(partial)
        # PyTorch's StyleLoss returns the input unchanged (transparent layer).
        return x

    __call__ = forward


# ---------------- reference (pure JAX, full-precision matmul) ----------------

def _gram_ref(x):
    a, b, c, d = x.shape
    f = x.reshape(a * b, c * d).astype(jnp.float32)
    g = jnp.dot(f, f.T, precision=jax.lax.Precision.HIGHEST)
    return g / float(a * b * c * d)


def _style_loss_ref(x, target_feature):
    return jnp.mean((_gram_ref(x) - _gram_ref(target_feature)) ** 2)


if __name__ == "__main__":
    key = jax.random.PRNGKey(0)
    k1, k2, k3, k4 = jax.random.split(key, 4)

    # Primary check: small NCHW shapes (batch=2, channels=4, spatial=16x16).
    N, C, H, W = 2, 4, 16, 16
    target_feature = jax.random.normal(k1, (N, C, H, W), dtype=jnp.float32)
    x = jax.random.normal(k2, (N, C, H, W), dtype=jnp.float32)

    module = StyleLoss(target_feature)
    out = jax.block_until_ready(module.forward(x))
    loss = jax.block_until_ready(module.loss)

    ref_loss = _style_loss_ref(x, target_feature)
    assert out.shape == x.shape
    assert jnp.allclose(out, x), "forward must return input unchanged"
    assert jnp.allclose(loss, ref_loss, rtol=1e-5, atol=1e-8), (loss, ref_loss)
    assert jnp.allclose(module.target, _gram_ref(target_feature),
                        rtol=1e-5, atol=1e-6)
    assert jnp.allclose(gram_matrix(x), _gram_ref(x), rtol=1e-5, atol=1e-6)

    # Secondary check: exercises multiple row tiles (parallel axis), multiple
    # K tiles (VMEM accumulator) and the in-kernel row-tile slicing.
    N2, C2, H2, W2 = 1, 256, 48, 48
    tgt2 = jax.random.normal(k3, (N2, C2, H2, W2), dtype=jnp.float32)
    x2 = jax.random.normal(k4, (N2, C2, H2, W2), dtype=jnp.float32)
    mod2 = StyleLoss(tgt2)
    out2 = jax.block_until_ready(mod2.forward(x2))
    loss2 = jax.block_until_ready(mod2.loss)
    ref_loss2 = _style_loss_ref(x2, tgt2)
    assert jnp.allclose(out2, x2)
    assert jnp.allclose(loss2, ref_loss2, rtol=1e-4, atol=0.0), (loss2, ref_loss2)
    assert jnp.allclose(gram_matrix(x2), _gram_ref(x2), rtol=1e-4, atol=1e-6)

    print("KERNEL_OK")
</pallas_src>

<mosaic_0001>
module attributes {stable_mosaic.version = 11 : i64} {
  func.func @_gram_kernel(%arg0: i32, %arg1: i32, %arg2: memref<128x256xf32, #tpu.memory_space<vmem>>, %arg3: memref<128x128xf32, #tpu.memory_space<vmem>>, %arg4: memref<128x128xf32, #tpu.memory_space<vmem>>) attributes {dimension_semantics = [#tpu.dimension_semantics<parallel>, #tpu.dimension_semantics<arbitrary>], iteration_bounds = array<i64: 1, 1>, scalar_prefetch = 0 : i64, scratch_operands = 1 : i64, tpu.core_type = #tpu.core_type<tc>, window_params = [{transform_indices = @transform_0, window_bounds = array<i64: 128, 256>}, {transform_indices = @transform_1, window_bounds = array<i64: 128, 128>}]} {
    %c0_i32 = arith.constant 0 : i32
    %0 = arith.cmpi eq, %arg1, %c0_i32 : i32
    %1 = arith.extui %0 : i1 to i32
    %c0_i32_0 = arith.constant 0 : i32
    %2 = arith.cmpi ne, %1, %c0_i32_0 : i32
    scf.if %2 {
      %cst_9 = arith.constant 0.000000e+00 : f32
      %15 = vector.broadcast %cst_9 : f32 to vector<128x128xf32>
      %c0_10 = arith.constant 0 : index
      %c0_11 = arith.constant 0 : index
      %16 = vector.load %arg4[%c0_10, %c0_11] : memref<128x128xf32, #tpu.memory_space<vmem>>, vector<128x128xf32>
      tpu.vector_store %arg4[%c0_10, %c0_11], %15 {strides = array<i32>} : memref<128x128xf32, #tpu.memory_space<vmem>>, vector<128x128xf32>,
    } else {
    }
    %c0 = arith.constant 0 : index
    %c0_1 = arith.constant 0 : index
    %3 = vector.load %arg2[%c0, %c0_1] : memref<128x256xf32, #tpu.memory_space<vmem>>, vector<128x256xf32>
    %c128_i32 = arith.constant 128 : i32
    %4 = arith.muli %arg0, %c128_i32 : i32
    %5 = tpu.assume_multiple %4, 128 : i32
    %6 = arith.index_cast %5 : i32 to index
    %c0_2 = arith.constant 0 : index
    %7 = vector.load %arg2[%6, %c0_2] : memref<128x256xf32, #tpu.memory_space<vmem>>, vector<128x256xf32>
    %c0_3 = arith.constant 0 : index
    %c0_4 = arith.constant 0 : index
    %8 = vector.load %arg4[%c0_3, %c0_4] : memref<128x128xf32, #tpu.memory_space<vmem>>, vector<128x128xf32>
    %cst = arith.constant dense<0.000000e+00> : vector<128x128xf32>
    %9 = tpu.matmul %7, %3, %cst {dimension_numbers = #tpu.dot_dimension_numbers<[1], [1], [0], [0], [0, 0, 1, 0], [], []>} : vector<128x256xf32>, vector<128x256xf32>, vector<128x128xf32> -> vector<128x128xf32>
    %10 = arith.addf %8, %9 : vector<128x128xf32>
    %c0_5 = arith.constant 0 : index
    %c0_6 = arith.constant 0 : index
    %11 = vector.load %arg4[%c0_5, %c0_6] : memref<128x128xf32, #tpu.memory_space<vmem>>, vector<128x128xf32>
    tpu.vector_store %arg4[%c0_5, %c0_6], %10 {strides = array<i32>} : memref<128x128xf32, #tpu.memory_space<vmem>>, vector<128x128xf32>,
    %c0_i32_7 = arith.constant 0 : i32
    %12 = arith.cmpi eq, %arg1, %c0_i32_7 : i32
    %13 = arith.extui %12 : i1 to i32
    %c0_i32_8 = arith.constant 0 : i32
    %14 = arith.cmpi ne, %13, %c0_i32_8 : i32
    scf.if %14 {
      %c0_9 = arith.constant 0 : index
      %c0_10 = arith.constant 0 : index
      %15 = vector.load %arg4[%c0_9, %c0_10] : memref<128x128xf32, #tpu.memory_space<vmem>>, vector<128x128xf32>
      %cst_11 = arith.constant 4.8828125E-4 : f32
      %16 = vector.broadcast %cst_11 : f32 to vector<128x128xf32>
      %17 = arith.mulf %15, %16 : vector<128x128xf32>
      %c0_12 = arith.constant 0 : index
      %c0_13 = arith.constant 0 : index
      %18 = vector.load %arg3[%c0_12, %c0_13] : memref<128x128xf32, #tpu.memory_space<vmem>>, vector<128x128xf32>
      tpu.vector_store %arg3[%c0_12, %c0_13], %17 {strides = array<i32>} : memref<128x128xf32, #tpu.memory_space<vmem>>, vector<128x128xf32>,
    } else {
    }
    return
  }
  func.func @transform_0(%arg0: i32, %arg1: i32) -> (i32, i32) {
    %c0_i32 = arith.constant 0 : i32
    %c0_i32_0 = arith.constant 0 : i32
    return %c0_i32, %arg1 : i32, i32
  }
  func.func @transform_1(%arg0: i32, %arg1: i32) -> (i32, i32) {
    %c0_i32 = arith.constant 0 : i32
    %c0_i32_0 = arith.constant 0 : i32
    return %arg0, %c0_i32 : i32, i32
  }
}

</mosaic_0001>

<bundles_post_ra>
// kernel: tpu_custom_call.1
= control target key start
LH: loop header
LB: loop body
LE: loop exit
PB: predicated region body
PF: predicated region fallthrough
CT: control target
= control target key end

     0   :  { %6 = vsyncpa [#allocation4], 0  ;;  %s567_s0 = inlined_call_operand.hbm [shape: f32[128,256], index: 0, kind: input, shape index: {}]   ;;  %s568_s1 = inlined_call_operand.hbm [shape: f32[128,128], index: 1, kind: output, shape index: {}]  }
   0x1   :  { %7 = vsyncpa [#allocation5], 0  ;;  %s12_s8 = sshll.u32 %s567_s0, 4  ;;  %s455_s9 = smov [#allocation3]   ;;  %s13_s8 = int_to_ptr.hbm [resolvable:$true] %s12_s8 }
   0x2   :  { %s14_s10 = sshll.u32 %s455_s9, 4  ;;  %s456_s11 = smov 256   ;;  %s15_s10 = int_to_ptr.vmem [resolvable:$true] %s14_s10 }
   0x3   :  { %s457_s12 = smov 16  }
   0x4   :  { %20 = dma.hbm_to_vmem [thread:$0]  %s13_s8, 4096, %s15_s10, [#allocation4], %s456_s11, %s456_s11, %s457_s12  }
   0x5   :  { %451 = dma.done.wait [#allocation4], 4096  }
   0x6   :  { %452 = vsyncadd [#allocation4], 4294963200  ;;  %v474_v0 = vld [vmem:[#allocation3 + $0xf0] sm:$0xff]  ;;  %v476_v1 = vld [vmem:[#allocation3 + $0xf8] sm:$0xff]  ;;  %s458_s0 = smov [#allocation6]   ;;  %s350_s16 = sshll.u32 %s568_s1, 4  ;;  %s351_s16 = int_to_ptr.hbm [resolvable:$true] %s350_s16 }
   0x7   :  { %365 = vmatpush.xpose.msra.mxu2 %v474_v0  ;;  %381 = vmatpush.xpose.msra.mxu3 %v476_v1  ;;  %v480_v2 = vld [vmem:[#allocation3 + $0xe0] sm:$0xff]  ;;  %v482_v3 = vld [vmem:[#allocation3 + $0xe8] sm:$0xff]  ;;  %v488_v4 = vld [vmem:[#allocation3 + $0xd0] sm:$0xff]  ;;  %s348_s13 = sshll.u32 %s458_s0, 4  ;;  %s459_s17 = smov 128   ;;  %s349_s13 = int_to_ptr.vmem [resolvable:$true] %s348_s13 }
   0x8   :  { %131 = vmatpush.xpose.msra.mxu0 %v474_v0  ;;  %196 = vmatpush.xpose.msra.mxu1 %v476_v1  ;;  %v490_v5 = vld [vmem:[#allocation3 + $0xd8] sm:$0xff]  ;;  %v496_v6 = vld [vmem:[#allocation3 + $0xc0] sm:$0xff]  ;;  %v498_v7 = vld [vmem:[#allocation3 + $0xc8] sm:$0xff]  ;;  %s460_s18 = smov 8  }
   0x9   :  { %v504_v8 = vld [vmem:[#allocation3 + $0xb0] sm:$0xff]  ;;  %v506_v9 = vld [vmem:[#allocation3 + $0xb8] sm:$0xff]  ;;  %v512_v10 = vld [vmem:[#allocation3 + $0xa0] sm:$0xff] }
   0xa   :  { %v514_v11 = vld [vmem:[#allocation3 + $0xa8] sm:$0xff]  ;;  %v520_v12 = vld [vmem:[#allocation3 + $0x90] sm:$0xff]  ;;  %v522_v13 = vld [vmem:[#allocation3 + $0x98] sm:$0xff] }
   0xb   :  { %366 = vmatpush.xpose.msra.mxu2 %v480_v2  ;;  %382 = vmatpush.xpose.msra.mxu3 %v482_v3  ;;  %v61_v14 = vld [vmem:[#allocation3 + $0x80] sm:$0xff]  ;;  %v62_v15 = vld [vmem:[#allocation3 + $0x88] sm:$0xff]  ;;  %v530_v16 = vld [vmem:[#allocation3 + $0x70] sm:$0xff] }
   0xc   :  { %132 = vmatpush.xpose.msra.mxu0 %v480_v2  ;;  %197 = vmatpush.xpose.msra.mxu1 %v482_v3  ;;  %v532_v17 = vld [vmem:[#allocation3 + $0x78] sm:$0xff]  ;;  %v536_v18 = vld [vmem:[#allocation3 + $0x60] sm:$0xff]  ;;  %v538_v19 = vld [vmem:[#allocation3 + $0x68] sm:$0xff] }
   0xd   :  { %v55_v20 = vld [vmem:[#allocation3 + $0x50] sm:$0xff]  ;;  %v56_v21 = vld [vmem:[#allocation3 + $0x58] sm:$0xff]  ;;  %v53_v22 = vld [vmem:[#allocation3 + $0x40] sm:$0xff] }
   0xe   :  { %v54_v23 = vld [vmem:[#allocation3 + $0x48] sm:$0xff]  ;;  %v51_v24 = vld [vmem:[#allocation3 + $0x30] sm:$0xff]  ;;  %v52_v25 = vld [vmem:[#allocation3 + $0x38] sm:$0xff] }
   0xf   :  { %367 = vmatpush.xpose.msra.mxu2 %v488_v4  ;;  %383 = vmatpush.xpose.msra.mxu3 %v490_v5  ;;  %v49_v26 = vld [vmem:[#allocation3 + $0x20] sm:$0xff]  ;;  %v50_v27 = vld [vmem:[#allocation3 + $0x28] sm:$0xff]  ;;  %v47_v28 = vld [vmem:[#allocation3 + $0x10] sm:$0xff] }
  0x10   :  { %133 = vmatpush.xpose.msra.mxu0 %v488_v4  ;;  %198 = vmatpush.xpose.msra.mxu1 %v490_v5  ;;  %v48_v29 = vld [vmem:[#allocation3 + $0x18] sm:$0xff]  ;;  %v45_v30 = vld [vmem:[#allocation3] sm:$0xff]  ;;  %v46_v31 = vld [vmem:[#allocation3 + $0x8] sm:$0xff] }
  0x13   :  { %368 = vmatpush.xpose.msra.mxu2 %v496_v6  ;;  %384 = vmatpush.xpose.msra.mxu3 %v498_v7 }
  0x14   :  { %134 = vmatpush.xpose.msra.mxu0 %v496_v6  ;;  %199 = vmatpush.xpose.msra.mxu1 %v498_v7 }
  0x17   :  { %369 = vmatpush.xpose.msra.mxu2 %v504_v8  ;;  %385 = vmatpush.xpose.msra.mxu3 %v506_v9 }
  0x18   :  { %135 = vmatpush.xpose.msra.mxu0 %v504_v8  ;;  %200 = vmatpush.xpose.msra.mxu1 %v506_v9 }
  0x1b   :  { %370 = vmatpush.xpose.msra.mxu2 %v512_v10  ;;  %386 = vmatpush.xpose.msra.mxu3 %v514_v11 }
  0x1c   :  { %136 = vmatpush.xpose.msra.mxu0 %v512_v10  ;;  %201 = vmatpush.xpose.msra.mxu1 %v514_v11 }
  0x1f   :  { %371 = vmatpush.xpose.msra.mxu2 %v520_v12  ;;  %387 = vmatpush.xpose.msra.mxu3 %v522_v13 }
  0x20   :  { %137 = vmatpush.xpose.msra.mxu0 %v520_v12  ;;  %202 = vmatpush.xpose.msra.mxu1 %v522_v13 }
  0x23   :  { %372 = vmatpush.xpose.msra.mxu2 %v61_v14  ;;  %388 = vmatpush.xpose.msra.mxu3 %v62_v15 }
  0x24   :  { %138 = vmatpush.xpose.msra.mxu0 %v61_v14  ;;  %203 = vmatpush.xpose.msra.mxu1 %v62_v15 }
  0x27   :  { %373 = vmatpush.xpose.msra.mxu2 %v530_v16  ;;  %389 = vmatpush.xpose.msra.mxu3 %v532_v17 }
  0x28   :  { %139 = vmatpush.xpose.msra.mxu0 %v530_v16  ;;  %204 = vmatpush.xpose.msra.mxu1 %v532_v17 }
  0x2b   :  { %374 = vmatpush.xpose.msra.mxu2 %v536_v18  ;;  %390 = vmatpush.xpose.msra.mxu3 %v538_v19 }
  0x2c   :  { %140 = vmatpush.xpose.msra.mxu0 %v536_v18  ;;  %205 = vmatpush.xpose.msra.mxu1 %v538_v19 }
  0x2f   :  { %375 = vmatpush.xpose.msra.mxu2 %v55_v20  ;;  %391 = vmatpush.xpose.msra.mxu3 %v56_v21 }
  0x30   :  { %141 = vmatpush.xpose.msra.mxu0 %v55_v20  ;;  %206 = vmatpush.xpose.msra.mxu1 %v56_v21 }
  0x33   :  { %376 = vmatpush.xpose.msra.mxu2 %v53_v22  ;;  %392 = vmatpush.xpose.msra.mxu3 %v54_v23 }
  0x34   :  { %142 = vmatpush.xpose.msra.mxu0 %v53_v22  ;;  %207 = vmatpush.xpose.msra.mxu1 %v54_v23 }
  0x37   :  { %377 = vmatpush.xpose.msra.mxu2 %v51_v24  ;;  %393 = vmatpush.xpose.msra.mxu3 %v52_v25 }
  0x38   :  { %143 = vmatpush.xpose.msra.mxu0 %v51_v24  ;;  %208 = vmatpush.xpose.msra.mxu1 %v52_v25 }
  0x3b   :  { %378 = vmatpush.xpose.msra.mxu2 %v49_v26  ;;  %394 = vmatpush.xpose.msra.mxu3 %v50_v27 }
  0x3c   :  { %144 = vmatpush.xpose.msra.mxu0 %v49_v26  ;;  %209 = vmatpush.xpose.msra.mxu1 %v50_v27 }
  0x3f   :  { %379 = vmatpush.xpose.msra.mxu2 %v47_v28  ;;  %395 = vmatpush.xpose.msra.mxu3 %v48_v29 }
  0x40   :  { %145 = vmatpush.xpose.msra.mxu0 %v47_v28  ;;  %210 = vmatpush.xpose.msra.mxu1 %v48_v29 }
  0x43   :  { %380 = vmatpush.xpose.msra.mxu2 %v45_v30  ;;  %396 = vmatpush.xpose.msra.mxu3 %v46_v31 }
  0x44   :  { %146 = vmatpush.xpose.msra.mxu0 %v45_v30  ;;  %211 = vmatpush.xpose.msra.mxu1 %v46_v31 }
  0x46   :  { %171 = vmatmul.f32.vlgmr.msra.gmra.mxu2 %v61_v14  ;;  %236 = vmatmul.f32.vlgmr.msra.gmra.mxu3 %v62_v15 }
  0x47   :  { %147 = vmatmul.f32.vlgmr.msra.gmra.mxu0 %v45_v30  ;;  %212 = vmatmul.f32.vlgmr.msra.gmra.mxu1 %v46_v31 }
  0x4e   :  { %174 = vmatmul.f32.gmra.mxu2 %v520_v12  ;;  %239 = vmatmul.f32.gmra.mxu3 %v522_v13 }
  0x4f   :  { %150 = vmatmul.f32.gmra.mxu0 %v47_v28  ;;  %215 = vmatmul.f32.gmra.mxu1 %v48_v29 }
  0x56   :  { %177 = vmatmul.f32.gmra.mxu2 %v512_v10  ;;  %242 = vmatmul.f32.gmra.mxu3 %v514_v11 }
  0x57   :  { %153 = vmatmul.f32.gmra.mxu0 %v49_v26  ;;  %218 = vmatmul.f32.gmra.mxu1 %v50_v27 }
  0x5e   :  { %180 = vmatmul.f32.gmra.mxu2 %v504_v8  ;;  %245 = vmatmul.f32.gmra.mxu3 %v506_v9 }
  0x5f   :  { %156 = vmatmul.f32.gmra.mxu0 %v51_v24  ;;  %221 = vmatmul.f32.gmra.mxu1 %v52_v25 }
  0x66   :  { %183 = vmatmul.f32.gmra.mxu2 %v496_v6  ;;  %248 = vmatmul.f32.gmra.mxu3 %v498_v7 }
  0x67   :  { %159 = vmatmul.f32.gmra.mxu0 %v53_v22  ;;  %224 = vmatmul.f32.gmra.mxu1 %v54_v23 }
  0x6e   :  { %186 = vmatmul.f32.gmra.mxu2 %v488_v4  ;;  %251 = vmatmul.f32.gmra.mxu3 %v490_v5 }
  0x6f   :  { %162 = vmatmul.f32.gmra.mxu0 %v55_v20  ;;  %227 = vmatmul.f32.gmra.mxu1 %v56_v21 }
  0x76   :  { %189 = vmatmul.f32.gmra.mxu2 %v480_v2  ;;  %254 = vmatmul.f32.gmra.mxu3 %v482_v3 }
  0x77   :  { %165 = vmatmul.f32.gmra.mxu0 %v536_v18  ;;  %230 = vmatmul.f32.gmra.mxu1 %v538_v19 }
  0x7e   :  { %192 = vmatmul.f32.gmra.mxu2 %v474_v0  ;;  %257 = vmatmul.f32.gmra.mxu3 %v476_v1 }
  0x7f   :  { %168 = vmatmul.f32.gmra.mxu0 %v530_v16  ;;  %233 = vmatmul.f32.gmra.mxu1 %v532_v17 }
  0xc4   :  { %v148_v32 = vpop.f32.mrf.mxu0  ;;  %v213_v33 = vpop.f32.mrf.mxu1 }
  0xc5   :  { %v214_v34 = vadd.f32 %v213_v33, %v148_v32 }
  0xc7   :  { %v312_v35 = vmul.f32 0.00048828125, %v214_v34 }
  0xc9   :  { %v172_v36 = vpop.f32.mrf.mxu2  ;;  %328 = vst [vmem:[#allocation6] sm:$0xff] %v312_v35  ;;  %v237_v37 = vpop.f32.mrf.mxu3 }
  0xca   :  { %v238_v38 = vadd.f32 %v237_v37, %v172_v36 }
  0xcc   :  { %v320_v39 = vmul.f32 0.00048828125, %v238_v38  ;;  %v151_v40 = vpop.f32.mrf.mxu0  ;;  %v216_v41 = vpop.f32.mrf.mxu1 }
  0xcd   :  { %v217_v42 = vadd.f32 %v216_v41, %v151_v40 }
  0xce   :  { %336 = vst [vmem:[#allocation6 + $0x40] sm:$0xff] %v320_v39 }
  0xcf   :  { %v313_v43 = vmul.f32 0.00048828125, %v217_v42 }
  0xd1   :  { %v175_v44 = vpop.f32.mrf.mxu2  ;;  %329 = vst [vmem:[#allocation6 + $0x8] sm:$0xff] %v313_v43  ;;  %v240_v45 = vpop.f32.mrf.mxu3 }
  0xd2   :  { %v241_v46 = vadd.f32 %v240_v45, %v175_v44 }
  0xd4   :  { %v321_v47 = vmul.f32 0.00048828125, %v241_v46  ;;  %v154_v48 = vpop.f32.mrf.mxu0  ;;  %v219_v49 = vpop.f32.mrf.mxu1 }
  0xd5   :  { %v220_v50 = vadd.f32 %v219_v49, %v154_v48 }
  0xd6   :  { %337 = vst [vmem:[#allocation6 + $0x48] sm:$0xff] %v321_v47 }
  0xd7   :  { %v314_v51 = vmul.f32 0.00048828125, %v220_v50 }
  0xd9   :  { %v178_v52 = vpop.f32.mrf.mxu2  ;;  %330 = vst [vmem:[#allocation6 + $0x10] sm:$0xff] %v314_v51  ;;  %v243_v53 = vpop.f32.mrf.mxu3 }
  0xda   :  { %v244_v54 = vadd.f32 %v243_v53, %v178_v52 }
  0xdc   :  { %v322_v55 = vmul.f32 0.00048828125, %v244_v54  ;;  %v157_v56 = vpop.f32.mrf.mxu0  ;;  %v222_v57 = vpop.f32.mrf.mxu1 }
  0xdd   :  { %v223_v58 = vadd.f32 %v222_v57, %v157_v56 }
  0xde   :  { %338 = vst [vmem:[#allocation6 + $0x50] sm:$0xff] %v322_v55 }
  0xdf   :  { %v315_v59 = vmul.f32 0.00048828125, %v223_v58 }
  0xe1   :  { %v181_v60 = vpop.f32.mrf.mxu2  ;;  %331 = vst [vmem:[#allocation6 + $0x18] sm:$0xff] %v315_v59  ;;  %v246_v61 = vpop.f32.mrf.mxu3 }
  0xe2   :  { %v247_v62 = vadd.f32 %v246_v61, %v181_v60 }
  0xe4   :  { %v323_v63 = vmul.f32 0.00048828125, %v247_v62  ;;  %v160_v0 = vpop.f32.mrf.mxu0  ;;  %v225_v1 = vpop.f32.mrf.mxu1 }
  0xe5   :  { %v226_v2 = vadd.f32 %v225_v1, %v160_v0 }
  0xe6   :  { %339 = vst [vmem:[#allocation6 + $0x58] sm:$0xff] %v323_v63 }
  0xe7   :  { %v316_v3 = vmul.f32 0.00048828125, %v226_v2 }
  0xe9   :  { %v184_v4 = vpop.f32.mrf.mxu2  ;;  %332 = vst [vmem:[#allocation6 + $0x20] sm:$0xff] %v316_v3  ;;  %v249_v5 = vpop.f32.mrf.mxu3 }
  0xea   :  { %v250_v6 = vadd.f32 %v249_v5, %v184_v4 }
  0xec   :  { %v324_v7 = vmul.f32 0.00048828125, %v250_v6  ;;  %v163_v8 = vpop.f32.mrf.mxu0  ;;  %v228_v9 = vpop.f32.mrf.mxu1 }
  0xed   :  { %v229_v10 = vadd.f32 %v228_v9, %v163_v8 }
  0xee   :  { %340 = vst [vmem:[#allocation6 + $0x60] sm:$0xff] %v324_v7 }
  0xef   :  { %v317_v11 = vmul.f32 0.00048828125, %v229_v10 }
  0xf1   :  { %v187_v12 = vpop.f32.mrf.mxu2  ;;  %333 = vst [vmem:[#allocation6 + $0x28] sm:$0xff] %v317_v11  ;;  %v252_v13 = vpop.f32.mrf.mxu3 }
  0xf2   :  { %v253_v14 = vadd.f32 %v252_v13, %v187_v12 }
  0xf4   :  { %v325_v15 = vmul.f32 0.00048828125, %v253_v14  ;;  %v166_v16 = vpop.f32.mrf.mxu0  ;;  %v231_v17 = vpop.f32.mrf.mxu1 }
  0xf5   :  { %v232_v18 = vadd.f32 %v231_v17, %v166_v16 }
  0xf6   :  { %341 = vst [vmem:[#allocation6 + $0x68] sm:$0xff] %v325_v15 }
  0xf7   :  { %v318_v19 = vmul.f32 0.00048828125, %v232_v18 }
  0xf9   :  { %v190_v20 = vpop.f32.mrf.mxu2  ;;  %334 = vst [vmem:[#allocation6 + $0x30] sm:$0xff] %v318_v19  ;;  %v255_v21 = vpop.f32.mrf.mxu3 }
  0xfa   :  { %v256_v22 = vadd.f32 %v255_v21, %v190_v20 }
  0xfc   :  { %v326_v23 = vmul.f32 0.00048828125, %v256_v22  ;;  %v169_v24 = vpop.f32.mrf.mxu0  ;;  %v234_v25 = vpop.f32.mrf.mxu1 }
  0xfd   :  { %v235_v26 = vadd.f32 %v234_v25, %v169_v24 }
  0xfe   :  { %342 = vst [vmem:[#allocation6 + $0x70] sm:$0xff] %v326_v23 }
  0xff   :  { %v319_v27 = vmul.f32 0.00048828125, %v235_v26 }
 0x101   :  { %v193_v28 = vpop.f32.mrf.mxu2  ;;  %335 = vst [vmem:[#allocation6 + $0x38] sm:$0xff] %v319_v27  ;;  %v258_v29 = vpop.f32.mrf.mxu3 }
 0x102   :  { %v259_v30 = vadd.f32 %v258_v29, %v193_v28 }
 0x104   :  { %v327_v31 = vmul.f32 0.00048828125, %v259_v30 }
 0x106   :  { %343 = vst [vmem:[#allocation6 + $0x78] sm:$0xff] %v327_v31 }
 0x107   :  { %356 = dma.vmem_to_hbm [thread:$0]  %s349_s13, 2048, %s351_s16, [#allocation5], %s459_s17, %s459_s17, %s460_s18  }
 0x108   :  { %453 = dma.done.wait [#allocation5], 2048  }
 0x109   :  { %454 = vsyncadd [#allocation5], 4294965248 }
 0x10a   :  { %361 = vsyncpa [#allocation4], 1 }
 0x10b   :  { %362 = vsyncpa [#allocation5], 1 }

</bundles_post_ra>
